<compile_context>
chip_gen: v5e
topology: v5e:2x2
jax: 0.10.0
libtpu: 0.0.40
codegen_flags: <defaults>
</compile_context>

<pallas_src>
import functools

import jax
import jax.numpy as jnp
from jax.experimental import pallas as pl
from jax.experimental.pallas import tpu as pltpu

_LANES = 128


def _round_up(x, m):
    return ((x + m - 1) // m) * m


def value_net_kernel(xt_ref, w1_ref, b1_ref, w2_ref, w3_ref, b3_ref, o_ref):
    # xt_ref: (24, TILE_B)   w1_ref: (32, 24)   b1_ref: (32, 1)
    # w2_ref: (32, 32)       w3_ref: (1, 32)    b3_ref: (1, 1)
    # o_ref : (1, TILE_B)    -- lane-dense output row (batch on lanes)
    xt = xt_ref[...]                                        # arriving dtype

    # Layer 1: Linear(24 -> 32) + bias, ReLU.
    h1 = jnp.dot(w1_ref[...], xt, preferred_element_type=jnp.float32)
    h1 = jnp.maximum(h1 + b1_ref[...], 0.0)                 # (32, TILE_B)

    # Layer 2: Linear(32 -> 32), no bias, ReLU.
    h2 = jnp.dot(w2_ref[...], h1, preferred_element_type=jnp.float32)
    h2 = jnp.maximum(h2, 0.0)                               # (32, TILE_B)

    # Layer 3: Linear(32 -> 1) + bias -> already a lane-dense (1, TILE_B) row.
    out = jnp.dot(w3_ref[...], h2, preferred_element_type=jnp.float32)
    o_ref[...] = (out + b3_ref[...]).astype(o_ref.dtype)


def _choose_grid(B, max_tile_b):
    """Pick (tile_b, padded_B, num_tiles) for the batch-on-lanes layout."""
    if B <= 2 * _LANES:
        # Tiny batch: one tile whose block equals the full array -> no lane
        # divisibility constraint and no padding pass at all.
        return B, B, 1
    b_pad = _round_up(B, _LANES)
    # >= 2 tiles so v7x's two TensorCores both get work on the "parallel" axis
    # (harmless on single-TC v5e/v6e); tile capped so the per-tile footprint
    # (x tile + (32, TILE_B) f32 activations, double-buffered x) stays well
    # inside v7x's 32 MiB scoped VMEM while amortizing the ~0.35us/step grid cost.
    tile_b = min(max_tile_b, _round_up((b_pad + 1) // 2, _LANES))
    b_pad = _round_up(b_pad, tile_b)
    return tile_b, b_pad, b_pad // tile_b


@functools.partial(jax.jit, static_argnames=("max_tile_b",))
def value_net_forward_t(x_t, params, max_tile_b=8192):
    """Fast path. x_t: (24, B) feature-major. Returns the lane-dense (1, B) row."""
    w1, b1, w2, w3, b3 = params
    _, B = x_t.shape
    tile_b, b_pad, num_tiles = _choose_grid(B, max_tile_b)

    # Pad the batch (lane) axis only when a multi-tile grid needs it.
    if b_pad != B:
        x_t = jnp.pad(x_t, ((0, 0), (0, b_pad - B)))

    const = lambda i: (0, 0)  # resident weights/biases: constant block index

    out_row = pl.pallas_call(
        value_net_kernel,
        out_shape=jax.ShapeDtypeStruct((1, b_pad), jnp.float32),
        grid_spec=pltpu.PrefetchScalarGridSpec(
            num_scalar_prefetch=0,
            grid=(num_tiles,),
            in_specs=[
                pl.BlockSpec((24, tile_b), lambda i: (0, i)),  # x tiles stream
                pl.BlockSpec((32, 24), const),                 # W1 (resident)
                pl.BlockSpec((32, 1), const),                  # b1
                pl.BlockSpec((32, 32), const),                 # W2
                pl.BlockSpec((1, 32), const),                  # w3 row
                pl.BlockSpec((1, 1), const),                   # b3
            ],
            out_specs=pl.BlockSpec((1, tile_b), lambda i: (0, i)),
        ),
        compiler_params=pltpu.CompilerParams(
            dimension_semantics=("parallel",)),                # both TCs on v7x
    )(x_t, w1, b1, w2, w3, b3)

    return out_row[:, :B]


@jax.jit
def value_net_forward(x, params):
    """PyTorch-convention API: x (B, 24) -> (B, 1).

    The feature-major transpose and the lane-sparse (B, 1) reshape live only at
    this API boundary; hot-loop callers should use value_net_forward_t directly
    (supply (24, B), consume the (1, B) row) and skip both extra passes.
    """
    row = value_net_forward_t(jnp.transpose(x), params)
    return row.reshape(-1, 1)


def init_params(key):
    """PyTorch-style U(-1/sqrt(fan_in), +1/sqrt(fan_in)) init.

    Weights are stored in PyTorch's native (out_features, in_features) layout,
    which is exactly what the feature-major kernel consumes (h^T = W @ x^T).
    b1 is a (32, 1) column so it broadcasts along the lane (batch) axis.
    """
    k1, k2, k3, k4, k5 = jax.random.split(key, 5)

    def u(k, shape, fan_in):
        bound = 1.0 / jnp.sqrt(jnp.float32(fan_in))
        return jax.random.uniform(k, shape, jnp.float32, -bound, bound)

    w1 = u(k1, (32, 24), 24)
    b1 = u(k2, (32, 1), 24)
    w2 = u(k3, (32, 32), 32)     # bias=False layer
    w3 = u(k4, (1, 32), 32)      # Linear(32, 1) weight
    b3 = u(k5, (1, 1), 32)
    return (w1, b1, w2, w3, b3)


def value_net_reference(x, params):
    """True f32 plain-JAX reference in the PyTorch (batch-major) formulation."""
    w1, b1, w2, w3, b3 = params
    h1 = jnp.maximum(x @ w1.T + b1.T, 0.0)
    h2 = jnp.maximum(h1 @ w2.T, 0.0)
    return h2 @ w3.T + b3


if __name__ == "__main__":
    key = jax.random.PRNGKey(0)
    kx, kx2, kp = jax.random.split(key, 3)
    params = init_params(kp)

    # Small single-tile case (no padding, block == full array).
    B = 8
    x = jax.random.normal(kx, (B, 24), jnp.float32)
    out = jax.block_until_ready(value_net_forward(x, params))
    ref = value_net_reference(x, params)
    assert out.shape == (B, 1), out.shape
    assert jnp.allclose(out, ref, atol=1e-3, rtol=1e-3), "mismatch vs. f32 reference (B=8)"

    # Multi-tile case: exercises lane padding + the 2-tile "parallel" grid.
    B2 = 300
    x2 = jax.random.normal(kx2, (B2, 24), jnp.float32)
    out2 = jax.block_until_ready(value_net_forward(x2, params))
    ref2 = value_net_reference(x2, params)
    assert out2.shape == (B2, 1), out2.shape
    assert jnp.allclose(out2, ref2, atol=1e-3, rtol=1e-3), "mismatch vs. f32 reference (B=300)"

    print("KERNEL_OK")
</pallas_src>

<mosaic_0001>
module attributes {stable_mosaic.version = 11 : i64} {
  func.func @value_net_kernel(%arg0: i32, %arg1: memref<24x8xf32, #tpu.memory_space<vmem>>, %arg2: memref<32x24xf32, #tpu.memory_space<vmem>>, %arg3: memref<32x1xf32, #tpu.memory_space<vmem>>, %arg4: memref<32x32xf32, #tpu.memory_space<vmem>>, %arg5: memref<1x32xf32, #tpu.memory_space<vmem>>, %arg6: memref<1x1xf32, #tpu.memory_space<vmem>>, %arg7: memref<1x8xf32, #tpu.memory_space<vmem>>) attributes {dimension_semantics = [#tpu.dimension_semantics<parallel>], iteration_bounds = array<i64: 1>, scalar_prefetch = 0 : i64, scratch_operands = 0 : i64, tpu.core_type = #tpu.core_type<tc>, window_params = [{transform_indices = @transform_0, window_bounds = array<i64: 24, 8>}, {pipeline_mode = #tpu.pipeline_mode<synchronous>, transform_indices = @transform_1, window_bounds = array<i64: 32, 24>}, {pipeline_mode = #tpu.pipeline_mode<synchronous>, transform_indices = @transform_2, window_bounds = array<i64: 32, 1>}, {pipeline_mode = #tpu.pipeline_mode<synchronous>, transform_indices = @transform_3, window_bounds = array<i64: 32, 32>}, {pipeline_mode = #tpu.pipeline_mode<synchronous>, transform_indices = @transform_4, window_bounds = array<i64: 1, 32>}, {pipeline_mode = #tpu.pipeline_mode<synchronous>, transform_indices = @transform_5, window_bounds = array<i64: 1, 1>}, {transform_indices = @transform_6, window_bounds = array<i64: 1, 8>}]} {
    %c0 = arith.constant 0 : index
    %c0_0 = arith.constant 0 : index
    %0 = vector.load %arg1[%c0, %c0_0] : memref<24x8xf32, #tpu.memory_space<vmem>>, vector<24x8xf32>
    %c0_1 = arith.constant 0 : index
    %c0_2 = arith.constant 0 : index
    %1 = vector.load %arg2[%c0_1, %c0_2] : memref<32x24xf32, #tpu.memory_space<vmem>>, vector<32x24xf32>
    %cst = arith.constant dense<0.000000e+00> : vector<32x8xf32>
    %2 = tpu.matmul %1, %0, %cst {dimension_numbers = #tpu.dot_dimension_numbers<[1], [0], [0], [1], [0, 0, 1, 1], [], []>} : vector<32x24xf32>, vector<24x8xf32>, vector<32x8xf32> -> vector<32x8xf32>
    %c0_3 = arith.constant 0 : index
    %c0_4 = arith.constant 0 : index
    %3 = vector.load %arg3[%c0_3, %c0_4] : memref<32x1xf32, #tpu.memory_space<vmem>>, vector<32x1xf32>
    %4 = vector.broadcast %3 : vector<32x1xf32> to vector<32x8xf32>
    %5 = arith.addf %2, %4 : vector<32x8xf32>
    %cst_5 = arith.constant 0.000000e+00 : f32
    %6 = vector.broadcast %cst_5 : f32 to vector<32x8xf32>
    %7 = arith.maximumf %5, %6 : vector<32x8xf32>
    %c0_6 = arith.constant 0 : index
    %c0_7 = arith.constant 0 : index
    %8 = vector.load %arg4[%c0_6, %c0_7] : memref<32x32xf32, #tpu.memory_space<vmem>>, vector<32x32xf32>
    %cst_8 = arith.constant dense<0.000000e+00> : vector<32x8xf32>
    %9 = tpu.matmul %8, %7, %cst_8 {dimension_numbers = #tpu.dot_dimension_numbers<[1], [0], [0], [1], [0, 0, 1, 1], [], []>} : vector<32x32xf32>, vector<32x8xf32>, vector<32x8xf32> -> vector<32x8xf32>
    %cst_9 = arith.constant 0.000000e+00 : f32
    %10 = vector.broadcast %cst_9 : f32 to vector<32x8xf32>
    %11 = arith.maximumf %9, %10 : vector<32x8xf32>
    %c0_10 = arith.constant 0 : index
    %c0_11 = arith.constant 0 : index
    %12 = vector.load %arg5[%c0_10, %c0_11] : memref<1x32xf32, #tpu.memory_space<vmem>>, vector<1x32xf32>
    %cst_12 = arith.constant dense<0.000000e+00> : vector<1x8xf32>
    %13 = tpu.matmul %12, %11, %cst_12 {dimension_numbers = #tpu.dot_dimension_numbers<[1], [0], [0], [1], [0, 0, 1, 1], [], []>} : vector<1x32xf32>, vector<32x8xf32>, vector<1x8xf32> -> vector<1x8xf32>
    %c0_13 = arith.constant 0 : index
    %c0_14 = arith.constant 0 : index
    %14 = vector.load %arg6[%c0_13, %c0_14] : memref<1x1xf32, #tpu.memory_space<vmem>>, vector<1x1xf32>
    %15 = vector.broadcast %14 : vector<1x1xf32> to vector<1x8xf32>
    %16 = arith.addf %13, %15 : vector<1x8xf32>
    %c0_15 = arith.constant 0 : index
    %c0_16 = arith.constant 0 : index
    %17 = vector.load %arg7[%c0_15, %c0_16] : memref<1x8xf32, #tpu.memory_space<vmem>>, vector<1x8xf32>
    tpu.vector_store %arg7[%c0_15, %c0_16], %16 {strides = array<i32>} : memref<1x8xf32, #tpu.memory_space<vmem>>, vector<1x8xf32>,
    return
  }
  func.func @transform_0(%arg0: i32) -> (i32, i32) {
    %c0_i32 = arith.constant 0 : i32
    %c0_i32_0 = arith.constant 0 : i32
    return %c0_i32, %arg0 : i32, i32
  }
  func.func @transform_1(%arg0: i32) -> (i32, i32) {
    %c0_i32 = arith.constant 0 : i32
    %c0_i32_0 = arith.constant 0 : i32
    %c0_i32_1 = arith.constant 0 : i32
    return %c0_i32, %c0_i32_0 : i32, i32
  }
  func.func @transform_2(%arg0: i32) -> (i32, i32) {
    %c0_i32 = arith.constant 0 : i32
    %c0_i32_0 = arith.constant 0 : i32
    %c0_i32_1 = arith.constant 0 : i32
    return %c0_i32, %c0_i32_0 : i32, i32
  }
  func.func @transform_3(%arg0: i32) -> (i32, i32) {
    %c0_i32 = arith.constant 0 : i32
    %c0_i32_0 = arith.constant 0 : i32
    %c0_i32_1 = arith.constant 0 : i32
    return %c0_i32, %c0_i32_0 : i32, i32
  }
  func.func @transform_4(%arg0: i32) -> (i32, i32) {
    %c0_i32 = arith.constant 0 : i32
    %c0_i32_0 = arith.constant 0 : i32
    %c0_i32_1 = arith.constant 0 : i32
    return %c0_i32, %c0_i32_0 : i32, i32
  }
  func.func @transform_5(%arg0: i32) -> (i32, i32) {
    %c0_i32 = arith.constant 0 : i32
    %c0_i32_0 = arith.constant 0 : i32
    %c0_i32_1 = arith.constant 0 : i32
    return %c0_i32, %c0_i32_0 : i32, i32
  }
  func.func @transform_6(%arg0: i32) -> (i32, i32) {
    %c0_i32 = arith.constant 0 : i32
    %c0_i32_0 = arith.constant 0 : i32
    return %c0_i32, %arg0 : i32, i32
  }
}

</mosaic_0001>

<bundles_post_ra>
// kernel: value_net_forward_t.1
= control target key start
LH: loop header
LB: loop body
LE: loop exit
PB: predicated region body
PF: predicated region fallthrough
CT: control target
= control target key end

     0   :  { %s349_s0 = inlined_call_operand.vmem [shape: f32[24,8], index: 0, kind: input, shape index: {}]   ;;  %s350_s1 = inlined_call_operand.vmem [shape: f32[32,24], index: 1, kind: input, shape index: {}]   ;;  %s351_s2 = inlined_call_operand.vmem [shape: f32[32,1], index: 2, kind: input, shape index: {}]   ;;  %s352_s3 = inlined_call_operand.vmem [shape: f32[32,32], index: 3, kind: input, shape index: {}]   ;;  %s353_s4 = inlined_call_operand.vmem [shape: f32[1,32], index: 4, kind: input, shape index: {}]   ;;  %s354_s5 = inlined_call_operand.<no memory space> [shape: f32[1,1], index: 5, kind: input, shape index: {}]   ;;  %s355_s6 = inlined_call_operand.hbm [shape: f32[1,8], index: 6, kind: output, shape index: {}]  }
   0x1   :  { %v11_v0 = vstv %s354_s5 }
   0x2   :  { %12 = vst [vmem:[#allocation2] sm:$0x1] %v11_v0 }
   0x3   :  { %v28_v1 = vld [vmem:[%s349_s0 + $0x10] sm:$0xff]  ;;  %v27_v2 = vld [vmem:[%s349_s0 + $0x8] sm:$0xff]  ;;  %v249_v3 = vmov 0   ;;  %v26_v5 = vld [vmem:[%s349_s0] sm:$0xff]  ;;  %vm57_vm0 = vcmask 195584  }
   0x4   :  { %83 = vmatpush.msra.mxu0 %v28_v1  ;;  %221 = vset.pattern.permute.xlu1 %v249_v3  ;;  %v34_v4 = vld [vmem:[%s351_s2 + $0x8] sm:$0xff]  ;;  %v36_v6 = vld [vmem:[%s351_s2 + $0x18] sm:$0xff]  ;;  %v29_v7 = vld [vmem:[%s350_s1] sm:$0xff] }
   0x5   :  { %44 = vperm.xlu1 %221, %v34_v4   ;;  %211 = vmatpush.msra.mxu1 %v28_v1 }
   0x6   :  { %84 = vmatpush.msra.mxu0 %v27_v2  ;;  %220 = vset.pattern.permute.xlu0 %v249_v3 }
   0x7   :  { %13 = vsyncpa [#allocation4], 0  ;;  %212 = vmatpush.msra.mxu1 %v27_v2  ;;  %v32_v8 = vld [vmem:[%s350_s1 + $0x18] sm:$0xff]  ;;  %54 = vperm.xlu0 %220, %v36_v6   ;;  %v33_v9 = vld [vmem:[%s351_s2] sm:$0xff]  ;;  %vm107_vm1 = vcmask 261120   ;;  %s193_s30 = sshll.u32 %s355_s6, 4  ;;  %s194_s30 = int_to_ptr.hbm [resolvable:$true] %s193_s30 }
   0x8   :  { %85 = vmatpush.msra.mxu0 %v26_v5  ;;  %222 = vset.pattern.permute.xlu2 %v249_v3  ;;  %v35_v10 = vld [vmem:[%s351_s2 + $0x10] sm:$0xff]  ;;  %v30_v11 = vld [vmem:[%s350_s1 + $0x8] sm:$0xff]  ;;  %v103_v30 = vld [vmem:[%s352_s3] sm:$0xff]  ;;  %vm184_vm2 = vcmask 57344  }
   0x9   :  { %202 = vmatmul.msk.f32.vlgmr.msra.gmra.mxu0 %vm57_vm0, %v29_v7  ;;  %213 = vmatpush.msra.mxu1 %v26_v5  ;;  %v31_v12 = vld [vmem:[%s350_s1 + $0x10] sm:$0xff]  ;;  %v104_v29 = vld [vmem:[%s352_s3 + $0x8] sm:$0xff]  ;;  %v106_v32 = vld [vmem:[%s352_s3 + $0x18] sm:$0xff] }
   0xa   :  { %205 = vmatmul.msk.f32.vlgmr.msra.gmra.mxu1 %vm57_vm0, %v32_v8  ;;  %v105_v31 = vld [vmem:[%s352_s3 + $0x10] sm:$0xff]  ;;  %v154_v33 = vld [vmem:[#allocation2] sm:$0x1]  ;;  %s250_s3 = smov [#allocation3]  }
   0xb   :  { %157 = vperm.xlu2 %222, %v154_v33   ;;  %v153_v42 = vld [vmem:[%s353_s4] sm:$0x1]  ;;  %s191_s27 = sshll.u32 %s250_s3, 4  ;;  %s192_s27 = int_to_ptr.vmem [resolvable:$true] %s191_s27 }
   0xd   :  { %39 = vperm.xlu1 %221, %v33_v9  }
   0xf   :  { %49 = vperm.xlu0 %220, %v35_v10  }
  0x11   :  { %203 = vmatmul.msk.f32.gmra.mxu0 %vm57_vm0, %v30_v11 }
  0x19   :  { %204 = vmatmul.msk.f32.gmra.mxu0 %vm57_vm0, %v31_v12 }
  0x65   :  { %v158_v43 = vpop.permute.xlu2 %157 }
  0x66   :  { %v160_v44 = vperm.slane %v158_v43, 0 }
  0x77   :  { %v45_v18 = vpop.permute.xlu1 %44 }
  0x79   :  { %v55_v14 = vpop.permute.xlu0 %54 }
  0x7f   :  { %v40_v20 = vpop.permute.xlu1 %39 }
  0x81   :  { %v50_v21 = vpop.permute.xlu0 %49 }
  0x86   :  { %v87_v13 = vpop.f32.mrf.mxu0 }
  0x87   :  { %v96_v15 = vpop.f32.mrf.mxu1  ;;  %v88_v25 = vadd.f32 %v87_v13, %v40_v20 }
  0x88   :  { %v97_v16 = vadd.f32 %v96_v15, %v55_v14 }
  0x89   :  { %v99_v28 = vmax.f32 %v88_v25, 0.0 }
  0x8a   :  { %v102_v17 = vmax.f32 %v97_v16, 0.0 }
  0x8c   :  { %132 = vmatpush.msrb.mxu1 %v102_v17  ;;  %214 = vmatpush.msra.mxu3 %v102_v17 }
  0x8e   :  { %v90_v19 = vpop.f32.mrf.mxu0 }
  0x8f   :  { %v91_v23 = vadd.f32 %v90_v19, %v45_v18 }
  0x91   :  { %v100_v27 = vmax.f32 %v91_v23, 0.0 }
  0x96   :  { %v93_v22 = vpop.f32.mrf.mxu0 }
  0x97   :  { %v94_v24 = vadd.f32 %v93_v22, %v50_v21 }
  0x99   :  { %v101_v26 = vmax.f32 %v94_v24, 0.0 }
  0x9b   :  { %133 = vmatpush.msrb.mxu1 %v101_v26  ;;  %215 = vmatpush.msra.mxu3 %v101_v26 }
  0x9d   :  { %134 = vmatpush.msrb.mxu1 %v100_v27  ;;  %216 = vmatpush.msra.mxu3 %v100_v27 }
  0x9f   :  { %135 = vmatpush.msrb.mxu1 %v99_v28  ;;  %217 = vmatpush.msra.mxu3 %v99_v28 }
  0xa0   :  { %207 = vmatmul.msk.f32.vlgmr.msra.gmra.mxu3 %vm107_vm1, %v104_v29  ;;  %206 = vmatmul.msk.f32.vlgmr.msrb.gmra.mxu1 %vm107_vm1, %v103_v30 }
  0xa8   :  { %208 = vmatmul.msk.f32.gmra.mxu3 %vm107_vm1, %v105_v31 }
  0xb0   :  { %209 = vmatmul.msk.f32.gmra.mxu3 %vm107_vm1, %v106_v32 }
 0x11d   :  { %v137_v38 = vpop.f32.mrf.mxu1 }
 0x11e   :  { %v149_v41 = vmax.f32 %v137_v38, 0.0 }
 0x123   :  { %v140_v34 = vpop.f32.mrf.mxu3 }
 0x124   :  { %v150_v40 = vmax.f32 %v140_v34, 0.0 }
 0x12b   :  { %v143_v35 = vpop.f32.mrf.mxu3 }
 0x12c   :  { %v151_v39 = vmax.f32 %v143_v35, 0.0 }
 0x133   :  { %v146_v36 = vpop.f32.mrf.mxu3 }
 0x134   :  { %v152_v37 = vmax.f32 %v146_v36, 0.0 }
 0x136   :  { %176 = vmatpush.msra.mxu2 %v152_v37 }
 0x138   :  { %177 = vmatpush.msra.mxu2 %v151_v39 }
 0x13a   :  { %178 = vmatpush.msra.mxu2 %v150_v40 }
 0x13c   :  { %179 = vmatpush.msra.mxu2 %v149_v41 }
 0x13d   :  { %210 = vmatmul.msk.f32.vlgmr.msra.gmra.mxu2 %vm107_vm1, %v153_v42 }
 0x1c0   :  { %v181_v45 = vpop.f32.mrf.mxu2 }
 0x1c1   :  { %v182_v46 = vadd.f32 %v181_v45, %v160_v44 }
 0x1c3   :  { %185 = vst.msk [vmem:[#allocation3] sm:$0x1] %vm184_vm2, %v182_v46 }
 0x1c4   :  { %196 = dma.vmem_to_hbm [thread:$0]  %s192_s27, 16, %s194_s30, [#allocation4]  }
 0x1c5   :  { %247 = dma.done.wait [#allocation4], 16  }
 0x1c6   :  { %248 = vsyncadd [#allocation4], 4294967280 }
 0x1c7   :  { %201 = vsyncpa [#allocation4], 1 }

</bundles_post_ra>
